<compile_context>
chip_gen: v7x
topology: tpu7x:2x2x1
jax: 0.10.0
libtpu: 0.0.40
codegen_flags: <defaults>
</compile_context>

<pallas_src>
import functools

import jax
import jax.numpy as jnp
from jax.experimental import pallas as pl
from jax.experimental.pallas import tpu as pltpu

LANE = 128
SUBLANE = 8
_VMEM_LIMIT_BYTES = 64 * 1024 * 1024  # <= physical VMEM on v5e/v6e/v7x


def _round_up(x, m):
    return (x + m - 1) // m * m


def _pick_row_tile(batch, block_rows, min_tiles=2):
    """Row-tile: as big as possible, but giving >= min_tiles batch tiles when
    the batch allows it so the 'parallel' grid axis can be sharded across
    TensorCores (v7x has 2 TCs; the extra grid step is ~0.35us on 1-TC chips).
    """
    tb = min(_round_up(batch, SUBLANE), block_rows)
    if batch >= min_tiles * SUBLANE:
        tb = min(tb, _round_up((batch + min_tiles - 1) // min_tiles, SUBLANE))
    return tb, _round_up(batch, tb)


def _pad_cast(a, shape, dtype):
    """Cast to `dtype` and zero-pad to `shape`.  Fast path: already-aligned
    inputs are only (no-op) converted - no extra padded HBM copy."""
    a = a.astype(dtype)
    if a.shape == tuple(shape):
        return a
    idx = tuple(slice(0, s) for s in a.shape)
    return jnp.zeros(shape, dtype).at[idx].set(a)


# ----------------------------------------------------------------------------
# Single forward() call.  hb already folds U(prev_vec) + U_b + W_b (prev_vec
# is one shared row in the module, so U(prev_vec) is a constant row).
# ----------------------------------------------------------------------------
def _step_kernel(x_ref, hb_ref, w_w_ref, v_w_ref, v_b_ref, out_ref, h_ref):
    wx = jnp.dot(x_ref[...], w_w_ref[...], preferred_element_type=jnp.float32)
    h = jnp.maximum(wx + hb_ref[...], 0.0)                      # f32 [TB, Hp]
    h_ref[...] = h
    out_ref[...] = (
        jnp.dot(h.astype(v_w_ref.dtype), v_w_ref[...],
                preferred_element_type=jnp.float32) + v_b_ref[...]
    ).astype(out_ref.dtype)


@functools.partial(jax.jit,
                   static_argnames=("block_rows", "compute_dtype", "out_dtype"))
def rnn_no_ffnn_forward(x, h_prev, u_w, u_b, w_w, w_b, v_w, v_b,
                        *, block_rows=512, compute_dtype=jnp.bfloat16,
                        out_dtype=None):
    """One RNN_No_FFNN.forward().  x: [B, D]; h_prev: [H] or [1, H] (the
    module's shared prev_vec).  Weights are [in_features, out_features]
    (transposed vs. PyTorch); biases 1-D.  Returns (V(h_t) [B, D] in
    out_dtype, h_t [B, H] f32 = new prev_vec rows)."""
    B, D = x.shape
    H = u_w.shape[0]
    out_dtype = compute_dtype if out_dtype is None else out_dtype

    # Algebraic fold: U(prev_vec) + U_b + W_b is one constant f32 row.
    h_prev = jnp.reshape(h_prev, (1, H)).astype(jnp.float32)
    hb = (h_prev @ u_w.astype(jnp.float32)
          + u_b.astype(jnp.float32) + w_b.astype(jnp.float32))   # [1, H]

    Dp, Hp = _round_up(D, LANE), _round_up(H, LANE)
    TB, Bp = _pick_row_tile(B, block_rows)

    cd = compute_dtype
    x_p = _pad_cast(x, (Bp, Dp), cd)
    w_w_p = _pad_cast(w_w, (Dp, Hp), cd)
    v_w_p = _pad_cast(v_w, (Hp, Dp), cd)
    hb_p = _pad_cast(hb, (1, Hp), jnp.float32)
    v_b_p = _pad_cast(v_b.reshape(1, D), (1, Dp), jnp.float32)

    res1 = pl.Buffered(1)   # resident weights/biases: block index never changes
    out_p, h_p = pl.pallas_call(
        _step_kernel,
        out_shape=(
            jax.ShapeDtypeStruct((Bp, Dp), out_dtype),
            jax.ShapeDtypeStruct((Bp, Hp), jnp.float32),
        ),
        grid_spec=pltpu.PrefetchScalarGridSpec(
            num_scalar_prefetch=0,
            grid=(Bp // TB,),
            in_specs=[
                pl.BlockSpec((TB, Dp), lambda i: (i, 0)),                       # x rows
                pl.BlockSpec((1, Hp), lambda i: (0, 0), pipeline_mode=res1),    # folded bias
                pl.BlockSpec((Dp, Hp), lambda i: (0, 0), pipeline_mode=res1),   # W
                pl.BlockSpec((Hp, Dp), lambda i: (0, 0), pipeline_mode=res1),   # V
                pl.BlockSpec((1, Dp), lambda i: (0, 0), pipeline_mode=res1),    # V bias
            ],
            out_specs=[
                pl.BlockSpec((TB, Dp), lambda i: (i, 0)),                       # V(h_t)
                pl.BlockSpec((TB, Hp), lambda i: (i, 0)),                       # h_t
            ],
        ),
        compiler_params=pltpu.CompilerParams(
            dimension_semantics=("parallel",),
            vmem_limit_bytes=_VMEM_LIMIT_BYTES),
    )(x_p, hb_p, w_w_p, v_w_p, v_b_p)

    return out_p[:B, :D], h_p[:B, :H]


# ----------------------------------------------------------------------------
# Fused sequence: T chained forward() calls in a single pallas_call.
# grid = (batch_tiles ["parallel"], T ["arbitrary"]).  The hidden state is a
# VMEM-resident f32 output block (index_map ignores t); [U; W] is stacked so
# each step is ONE K=(Hp+Dp) MXU contraction.
# ----------------------------------------------------------------------------
def _seq_kernel(x_ref, uw_ref, hb_ref, v_w_ref, v_b_ref,
                out_ref, h_ref, cat_ref):
    t = pl.program_id(1)

    @pl.when(t == 0)
    def _():
        h_ref[...] = jnp.zeros_like(h_ref)          # prev_vec = 0 at t=0

    Hp = h_ref.shape[-1]
    # Stage [h_prev | x_t] so U(h)+W(x) becomes one full-depth contraction.
    cat_ref[:, :Hp] = h_ref[...].astype(cat_ref.dtype)
    cat_ref[:, Hp:] = x_ref[...].astype(cat_ref.dtype)

    z = jnp.dot(cat_ref[...], uw_ref[...], preferred_element_type=jnp.float32)
    h_t = jnp.maximum(z + hb_ref[...], 0.0)         # hb = U_b + W_b (f32)
    h_ref[...] = h_t                                # resident f32 carry
    out_ref[...] = (
        jnp.dot(h_t.astype(v_w_ref.dtype), v_w_ref[...],
                preferred_element_type=jnp.float32) + v_b_ref[...]
    ).astype(out_ref.dtype)


@functools.partial(jax.jit,
                   static_argnames=("block_rows", "compute_dtype", "out_dtype"))
def rnn_no_ffnn_sequence(xs, u_w, u_b, w_w, w_b, v_w, v_b,
                         *, block_rows=512, compute_dtype=jnp.bfloat16,
                         out_dtype=None):
    """Equivalent to T successive forward() calls starting from prev_vec = 0:
        h_t = relu(U(h_{t-1}) + W(x_t)),  out_t = V(h_t)
    xs: [T, B, D].  Returns (outs [T, B, D] in out_dtype, h_T [B, H] f32)."""
    T, B, D = xs.shape
    H = u_w.shape[0]
    out_dtype = compute_dtype if out_dtype is None else out_dtype

    Dp, Hp = _round_up(D, LANE), _round_up(H, LANE)
    TB, Bp = _pick_row_tile(B, block_rows)

    cd = compute_dtype
    xs_p = _pad_cast(xs, (T, Bp, Dp), cd)
    # Stacked [U; W] -> single K=(Hp+Dp) contraction per time step.
    uw_p = jnp.zeros((Hp + Dp, Hp), cd)
    uw_p = uw_p.at[:H, :H].set(u_w.astype(cd))
    uw_p = uw_p.at[Hp:Hp + D, :H].set(w_w.astype(cd))
    v_w_p = _pad_cast(v_w, (Hp, Dp), cd)
    hb_p = _pad_cast((u_b + w_b).astype(jnp.float32).reshape(1, H),
                     (1, Hp), jnp.float32)
    v_b_p = _pad_cast(v_b.reshape(1, D), (1, Dp), jnp.float32)

    res1 = pl.Buffered(1)   # resident weights/biases
    outs_p, h_p = pl.pallas_call(
        _seq_kernel,
        out_shape=(
            jax.ShapeDtypeStruct((T, Bp, Dp), out_dtype),
            jax.ShapeDtypeStruct((Bp, Hp), jnp.float32),
        ),
        grid_spec=pltpu.PrefetchScalarGridSpec(
            num_scalar_prefetch=0,
            grid=(Bp // TB, T),                      # batch tiles outer, time inner
            in_specs=[
                pl.BlockSpec((None, TB, Dp), lambda j, t: (t, j, 0),
                             pipeline_mode=pl.Buffered(3)),                     # x_t stream
                pl.BlockSpec((Hp + Dp, Hp), lambda j, t: (0, 0),
                             pipeline_mode=res1),                               # [U; W]
                pl.BlockSpec((1, Hp), lambda j, t: (0, 0), pipeline_mode=res1), # U_b+W_b
                pl.BlockSpec((Hp, Dp), lambda j, t: (0, 0), pipeline_mode=res1),# V
                pl.BlockSpec((1, Dp), lambda j, t: (0, 0), pipeline_mode=res1), # V bias
            ],
            out_specs=[
                pl.BlockSpec((None, TB, Dp), lambda j, t: (t, j, 0)),           # out_t
                pl.BlockSpec((TB, Hp), lambda j, t: (j, 0)),                    # h carry
            ],
            scratch_shapes=[pltpu.VMEM((TB, Hp + Dp), cd)],                     # [h | x]
        ),
        compiler_params=pltpu.CompilerParams(
            dimension_semantics=("parallel", "arbitrary"),
            vmem_limit_bytes=_VMEM_LIMIT_BYTES),
    )(xs_p, uw_p, hb_p, v_w_p, v_b_p)

    return outs_p[:, :B, :D], h_p[:B, :H]


# ----------------------------------------------------------------------------
# Parameter init (PyTorch-Linear-like; weight stored as [in, out]).
# ----------------------------------------------------------------------------
def init_linear(key, fan_in, fan_out):
    kw, kb = jax.random.split(key)
    bound = 1.0 / jnp.sqrt(float(fan_in))
    w = jax.random.uniform(kw, (fan_in, fan_out), jnp.float32, -bound, bound)
    b = jax.random.uniform(kb, (fan_out,), jnp.float32, -bound, bound)
    return w, b


if __name__ == "__main__":
    hp_prec = jax.lax.Precision.HIGHEST
    key = jax.random.PRNGKey(0)

    def ref_step(params, h, x_t):
        u_w, u_b, w_w, w_b, v_w, v_b = params
        h_t = jnp.maximum(jnp.dot(h, u_w, precision=hp_prec) + u_b
                          + jnp.dot(x_t, w_w, precision=hp_prec) + w_b, 0.0)
        return h_t, jnp.dot(h_t, v_w, precision=hp_prec) + v_b

    # (H, D, B, T): one lane-aligned config (no-pad fast path, >=2 batch tiles)
    # and one small unaligned config (exercises the padded path).
    configs = [(128, 128, 256, 8), (32, 20, 5, 4)]
    for cfg_i, (H, D, B, T) in enumerate(configs):
        k = jax.random.fold_in(key, cfg_i)
        k_x, k_xs, k_u, k_w, k_v = jax.random.split(k, 5)
        u_w, u_b = init_linear(k_u, H, H)          # U: H -> H
        w_w, w_b = init_linear(k_w, D, H)          # W: D -> H
        v_w, v_b = init_linear(k_v, H, D)          # V: H -> D
        params = (u_w, u_b, w_w, w_b, v_w, v_b)

        # ---- 1) single forward() (module-exact: shared prev_vec row) -------
        x = jax.random.normal(k_x, (B, D), jnp.float32)
        h_prev = jnp.zeros((H,), jnp.float32)      # self.prev_vec at init
        ref_h, ref_out = ref_step(params, h_prev[None, :], x)

        out32, h32 = rnn_no_ffnn_forward(x, h_prev, *params,
                                         compute_dtype=jnp.float32,
                                         out_dtype=jnp.float32)
        jax.block_until_ready((out32, h32))
        assert jnp.allclose(out32, ref_out, atol=2e-3, rtol=2e-3), "fwd out f32"
        assert jnp.allclose(h32, ref_h, atol=2e-3, rtol=2e-3), "fwd h f32"

        out_bf, h_bf = rnn_no_ffnn_forward(x, h_prev, *params)   # bf16 default
        jax.block_until_ready((out_bf, h_bf))
        assert jnp.allclose(out_bf.astype(jnp.float32), ref_out,
                            atol=6e-2, rtol=6e-2), "fwd out bf16"
        assert jnp.allclose(h_bf, ref_h, atol=6e-2, rtol=6e-2), "fwd h bf16"

        # ---- 2) fused sequence: T chained forward() calls from prev_vec=0 --
        xs = jax.random.normal(k_xs, (T, B, D), jnp.float32)
        ref_hT, ref_outs = jax.lax.scan(
            functools.partial(ref_step, params),
            jnp.zeros((B, H), jnp.float32), xs)

        outs32, hT32 = rnn_no_ffnn_sequence(xs, *params,
                                            compute_dtype=jnp.float32,
                                            out_dtype=jnp.float32)
        jax.block_until_ready((outs32, hT32))
        assert jnp.allclose(outs32, ref_outs, atol=2e-3, rtol=2e-3), "seq out f32"
        assert jnp.allclose(hT32, ref_hT, atol=2e-3, rtol=2e-3), "seq h f32"

        outs_bf, hT_bf = rnn_no_ffnn_sequence(xs, *params)       # bf16 + bf16 outs
        jax.block_until_ready((outs_bf, hT_bf))
        assert jnp.allclose(outs_bf.astype(jnp.float32), ref_outs,
                            atol=8e-2, rtol=8e-2), "seq out bf16"
        assert jnp.allclose(hT_bf, ref_hT, atol=8e-2, rtol=8e-2), "seq h bf16"

    print("KERNEL_OK")
</pallas_src>

<mosaic_0001>
module attributes {stable_mosaic.version = 11 : i64} {
  func.func @_step_kernel(%arg0: i32, %arg1: memref<128x128xf32, #tpu.memory_space<vmem>>, %arg2: memref<1x128xf32, #tpu.memory_space<vmem>>, %arg3: memref<128x128xf32, #tpu.memory_space<vmem>>, %arg4: memref<128x128xf32, #tpu.memory_space<vmem>>, %arg5: memref<1x128xf32, #tpu.memory_space<vmem>>, %arg6: memref<128x128xf32, #tpu.memory_space<vmem>>, %arg7: memref<128x128xf32, #tpu.memory_space<vmem>>) attributes {dimension_semantics = [#tpu.dimension_semantics<parallel>], iteration_bounds = array<i64: 2>, scalar_prefetch = 0 : i64, scratch_operands = 0 : i64, tpu.core_type = #tpu.core_type<tc>, window_params = [{transform_indices = @transform_0, window_bounds = array<i64: 128, 128>}, {pipeline_mode = #tpu.pipeline_mode<synchronous>, transform_indices = @transform_1, window_bounds = array<i64: 1, 128>}, {pipeline_mode = #tpu.pipeline_mode<synchronous>, transform_indices = @transform_2, window_bounds = array<i64: 128, 128>}, {pipeline_mode = #tpu.pipeline_mode<synchronous>, transform_indices = @transform_3, window_bounds = array<i64: 128, 128>}, {pipeline_mode = #tpu.pipeline_mode<synchronous>, transform_indices = @transform_4, window_bounds = array<i64: 1, 128>}, {transform_indices = @transform_5, window_bounds = array<i64: 128, 128>}, {transform_indices = @transform_6, window_bounds = array<i64: 128, 128>}]} {
    %c0 = arith.constant 0 : index
    %c0_0 = arith.constant 0 : index
    %0 = vector.load %arg1[%c0, %c0_0] : memref<128x128xf32, #tpu.memory_space<vmem>>, vector<128x128xf32>
    %c0_1 = arith.constant 0 : index
    %c0_2 = arith.constant 0 : index
    %1 = vector.load %arg3[%c0_1, %c0_2] : memref<128x128xf32, #tpu.memory_space<vmem>>, vector<128x128xf32>
    %cst = arith.constant dense<0.000000e+00> : vector<128x128xf32>
    %2 = tpu.matmul %0, %1, %cst {dimension_numbers = #tpu.dot_dimension_numbers<[1], [0], [0], [1], [0, 0, 1, 1], [], []>} : vector<128x128xf32>, vector<128x128xf32>, vector<128x128xf32> -> vector<128x128xf32>
    %c0_3 = arith.constant 0 : index
    %c0_4 = arith.constant 0 : index
    %3 = vector.load %arg2[%c0_3, %c0_4] : memref<1x128xf32, #tpu.memory_space<vmem>>, vector<1x128xf32>
    %4 = vector.broadcast %3 : vector<1x128xf32> to vector<128x128xf32>
    %5 = arith.addf %2, %4 : vector<128x128xf32>
    %cst_5 = arith.constant 0.000000e+00 : f32
    %6 = vector.broadcast %cst_5 : f32 to vector<128x128xf32>
    %7 = arith.maximumf %5, %6 : vector<128x128xf32>
    %c0_6 = arith.constant 0 : index
    %c0_7 = arith.constant 0 : index
    %8 = vector.load %arg7[%c0_6, %c0_7] : memref<128x128xf32, #tpu.memory_space<vmem>>, vector<128x128xf32>
    tpu.vector_store %arg7[%c0_6, %c0_7], %7 {strides = array<i32>} : memref<128x128xf32, #tpu.memory_space<vmem>>, vector<128x128xf32>,
    %c0_8 = arith.constant 0 : index
    %c0_9 = arith.constant 0 : index
    %9 = vector.load %arg4[%c0_8, %c0_9] : memref<128x128xf32, #tpu.memory_space<vmem>>, vector<128x128xf32>
    %cst_10 = arith.constant dense<0.000000e+00> : vector<128x128xf32>
    %10 = tpu.matmul %7, %9, %cst_10 {dimension_numbers = #tpu.dot_dimension_numbers<[1], [0], [0], [1], [0, 0, 1, 1], [], []>} : vector<128x128xf32>, vector<128x128xf32>, vector<128x128xf32> -> vector<128x128xf32>
    %c0_11 = arith.constant 0 : index
    %c0_12 = arith.constant 0 : index
    %11 = vector.load %arg5[%c0_11, %c0_12] : memref<1x128xf32, #tpu.memory_space<vmem>>, vector<1x128xf32>
    %12 = vector.broadcast %11 : vector<1x128xf32> to vector<128x128xf32>
    %13 = arith.addf %10, %12 : vector<128x128xf32>
    %c0_13 = arith.constant 0 : index
    %c0_14 = arith.constant 0 : index
    %14 = vector.load %arg6[%c0_13, %c0_14] : memref<128x128xf32, #tpu.memory_space<vmem>>, vector<128x128xf32>
    tpu.vector_store %arg6[%c0_13, %c0_14], %13 {strides = array<i32>} : memref<128x128xf32, #tpu.memory_space<vmem>>, vector<128x128xf32>,
    return
  }
  func.func @transform_0(%arg0: i32) -> (i32, i32) {
    %c0_i32 = arith.constant 0 : i32
    %c0_i32_0 = arith.constant 0 : i32
    return %arg0, %c0_i32 : i32, i32
  }
  func.func @transform_1(%arg0: i32) -> (i32, i32) {
    %c0_i32 = arith.constant 0 : i32
    %c0_i32_0 = arith.constant 0 : i32
    %c0_i32_1 = arith.constant 0 : i32
    return %c0_i32, %c0_i32_0 : i32, i32
  }
  func.func @transform_2(%arg0: i32) -> (i32, i32) {
    %c0_i32 = arith.constant 0 : i32
    %c0_i32_0 = arith.constant 0 : i32
    %c0_i32_1 = arith.constant 0 : i32
    return %c0_i32, %c0_i32_0 : i32, i32
  }
  func.func @transform_3(%arg0: i32) -> (i32, i32) {
    %c0_i32 = arith.constant 0 : i32
    %c0_i32_0 = arith.constant 0 : i32
    %c0_i32_1 = arith.constant 0 : i32
    return %c0_i32, %c0_i32_0 : i32, i32
  }
  func.func @transform_4(%arg0: i32) -> (i32, i32) {
    %c0_i32 = arith.constant 0 : i32
    %c0_i32_0 = arith.constant 0 : i32
    %c0_i32_1 = arith.constant 0 : i32
    return %c0_i32, %c0_i32_0 : i32, i32
  }
  func.func @transform_5(%arg0: i32) -> (i32, i32) {
    %c0_i32 = arith.constant 0 : i32
    %c0_i32_0 = arith.constant 0 : i32
    return %arg0, %c0_i32 : i32, i32
  }
  func.func @transform_6(%arg0: i32) -> (i32, i32) {
    %c0_i32 = arith.constant 0 : i32
    %c0_i32_0 = arith.constant 0 : i32
    return %arg0, %c0_i32 : i32, i32
  }
}

</mosaic_0001>

<bundles_post_ra>
// kernel: rnn_no_ffnn_forward.1
= control target key start
LH: loop header
LB: loop body
LE: loop exit
PB: predicated region body
PF: predicated region fallthrough
CT: control target
= control target key end

     0   :  { %12 = vsyncpa [#allocation3], 0  ;;  %s1978_s0 = inlined_call_operand.hbm [shape: f32[256,128], index: 0, kind: input, shape index: {}]   ;;  %s1979_s1 = inlined_call_operand.hbm [shape: f32[1,128], index: 1, kind: input, shape index: {}]   ;;  %s1980_s2 = inlined_call_operand.hbm [shape: f32[128,128], index: 2, kind: input, shape index: {}]   ;;  %s1981_s3 = inlined_call_operand.hbm [shape: f32[128,128], index: 3, kind: input, shape index: {}]   ;;  %s1982_s4 = inlined_call_operand.hbm [shape: f32[1,128], index: 4, kind: input, shape index: {}]   ;;  %s1983_s5 = inlined_call_operand.hbm [shape: f32[256,128], index: 5, kind: output, shape index: {0}]   ;;  %s1984_s6 = inlined_call_operand.hbm [shape: f32[256,128], index: 6, kind: output, shape index: {1}]  }
   0x1   :  { %14 = vsyncpa [#allocation3 + $0x1], 0 }
   0x2   :  { %15 = vsyncpa [#allocation6], 0 }
   0x3   :  { %16 = vsyncpa [#allocation9], 0 }
   0x4   :  { %17 = vsyncpa [#allocation4], 0 }
   0x5   :  { %19 = vsyncpa [#allocation4 + $0x1], 0 }
   0x6   :  { %20 = vsyncpa [#allocation13], 0 }
   0x7   :  { %22 = vsyncpa [#allocation13 + $0x1], 0  ;;  %s1579_s21 = smov 0   ;;  %s1581_s22 = smov 0  }
   0x8   :  { %s1583_s23 = smov 0   ;;  %s1585_s24 = smov 0  }
   0x9 LB: > { %s1600_s25 = sadd.s32 4294967295, %s1531_s24   ;;  %s916_s26 = sadd.s32 4294967294, %s1531_s24   ;;  %s1531_s24 = sphi %s1585_s24, %s2007_s24   ;;  %s1527_s23 = sphi %s1583_s23, %s2006_s23   ;;  %s1523_s22 = sphi %s1581_s22, %s2005_s22   ;;  %s1519_s21 = sphi %s1579_s21, %s2004_s21  }
   0xa   : > { %p48_p0 = scmp.ne.s32.totalorder %s1523_s22, %s1519_s21  ;;  %p1985_p1 = scmp.eq.s32.totalorder %s1600_s25, 0 }
   0xb   : > { %p162_p3 = scmp.eq.s32.totalorder %s916_s26, 1  ;;  %p917_p5 = scmp.ge.s32.totalorder %s1531_s24, 1 }
   0xc   : > { %p1609_p4 = por %p1985_p1, %p48_p0  ;;  %p195_p7 = scmp.lt.s32.totalorder %s1531_s24, 3 }
   0xd   : > { %p1614_p6 = por %p162_p3, %p48_p0  ;;  %s1533_s30 = smov [#allocation5]  }
   0xe   : > { %s1988_s27 = scalar_select %p1609_p4, 1, 0 }
   0xf   : > { %s1989_s28 = scalar_select %p1614_p6, 1, 0 }
  0x10   : > { %p1619_p8 = pnand %p917_p5, %p195_p7  ;;  %s208_s7 = sshll.u32 %s1533_s30, 4  ;;  %s209_s7 = int_to_ptr.vmem [resolvable:$true] %s208_s7 }
  0x11   : > { %s1534_s9 = smov [#allocation8]   ;;  %s1535_s11 = smov [#allocation7]  }
  0x12   : > { %s1990_s29 = scalar_select %p1619_p8, 1, 0 }
  0x13   : > { %p1209_p10 = pneg %p1619_p8  ;;  %s231_s10 = sshll.u32 %s1534_s9, 4  ;;  %s1632_s10 = int_to_ptr.vmem [resolvable:$true] %s231_s10 }
  0x14   : > { %s1634_s12 = sshll.u32 %s1535_s11, 4  ;;  %s1283_s15 = scalar_lea.hbm %s1979_s1, 16  ;;  %s219_s12 = int_to_ptr.vmem [resolvable:$true] %s1634_s12 }
  0x15   : > { %p1628_p11 = pnand %p1209_p10, %p1985_p1  ;;  %p1284_p12 = scmp.ne.s32.totalorder %s1979_s1, %s1283_s15 }
  0x16   : > { %p1290_p5 = scmp.lt.u32.totalorder %s1283_s15, %s1979_s1 }
  0x17   : > { %p1644_p13 = pneg %p1628_p11 }
  0x19   : > { %p1286_p0 = pnand %p1644_p13, %p1284_p12 }
  0x1b   : > { %p1287_p3 = pneg %p1286_p0 }
  0x1d   : > { %p1292_p7 = pnand %p1290_p5, %p1287_p3 }
  0x1f   : > { %1295 = shalt.err (!%p1292_p7)
}
  0x20   : > { %s1296_s26 = scalar_lea.vmem %s209_s7, 16  ;;  %s1303_s30 = scalar_lea.vmem %s209_s7, 32 }
  0x21   : > { %p1297_p10 = scmp.ne.s32.totalorder %s209_s7, %s1296_s26  ;;  %p1304_p2 = scmp.lt.s32.totalorder %s209_s7, %s209_s7 }
  0x22   : > { %p1305_p6 = scmp.lt.s32.totalorder %s1303_s30, %s1296_s26 }
  0x23   : > { %p1299_p9 = pnand %p1297_p10, %p1644_p13 }
  0x24   : > { %p1306_p4 = por %p1305_p6, %p1304_p2 }
  0x25   : > { %p1300_p1 = pneg %p1299_p9 }
  0x27   : > { %p1307_p8 = pnand %p1306_p4, %p1300_p1 }
  0x29   : > { %1310 = shalt.err (!%p1307_p8)
}
  0x2a   : > { %1212 = dma.hbm_to_vmem [thread:$0]  (!%p1628_p11), %s1979_s1, 16, %s209_s7, [#allocation6]  }
  0x2b   : > { %s1311_s15 = scalar_lea.hbm %s1981_s3, 2048 }
  0x2c   : > { %p1312_p9 = scmp.ne.s32.totalorder %s1981_s3, %s1311_s15  ;;  %p1318_p1 = scmp.lt.u32.totalorder %s1311_s15, %s1981_s3 }
  0x2e   : > { %p1314_p12 = pnand %p1312_p9, %p1644_p13 }
  0x30   : > { %p1315_p2 = pneg %p1314_p12 }
  0x32   : > { %p1320_p4 = pnand %p1318_p1, %p1315_p2 }
  0x34   : > { %1323 = shalt.err (!%p1320_p4)
}
  0x35   : > { %s1324_s7 = scalar_lea.vmem %s1632_s10, 2048  ;;  %p1332_p3 = scmp.lt.s32.totalorder %s1632_s10, %s1632_s10 }
  0x36   : > { %p1325_p6 = scmp.ne.s32.totalorder %s1632_s10, %s1324_s7  ;;  %p1333_p5 = scmp.lt.s32.totalorder %s1324_s7, %s1324_s7 }
  0x38   : > { %p1327_p8 = pnand %p1325_p6, %p1644_p13  ;;  %p1334_p7 = por %p1333_p5, %p1332_p3 }
  0x3a   : > { %p1328_p0 = pneg %p1327_p8 }
  0x3c   : > { %p1335_p10 = pnand %p1334_p7, %p1328_p0 }
  0x3e   : > { %1338 = shalt.err (!%p1335_p10)
}
  0x3f   : > { %s1536_s26 = smov 128   ;;  %s1537_s30 = smov 8  }
  0x40   : > { %1218 = dma.hbm_to_vmem [thread:$0]  (!%p1628_p11), %s1981_s3, 2048, %s1632_s10, [#allocation9], %s1536_s26, %s1536_s26, %s1537_s30  }
  0x41   : > { %s1339_s15 = scalar_lea.hbm %s1980_s2, 2048 }
  0x42   : > { %p1340_p9 = scmp.ne.s32.totalorder %s1980_s2, %s1339_s15  ;;  %p1346_p1 = scmp.lt.u32.totalorder %s1339_s15, %s1980_s2 }
  0x44   : > { %p1342_p12 = pnand %p1340_p9, %p1644_p13 }
  0x46   : > { %p1343_p2 = pneg %p1342_p12 }
  0x48   : > { %p1348_p4 = pnand %p1346_p1, %p1343_p2 }
  0x4a   : > { %1351 = shalt.err (!%p1348_p4)
}
  0x4b   : > { %s1352_s7 = scalar_lea.vmem %s219_s12, 2048  ;;  %p1360_p3 = scmp.lt.s32.totalorder %s219_s12, %s219_s12 }
  0x4c   : > { %p1353_p6 = scmp.ne.s32.totalorder %s219_s12, %s1352_s7  ;;  %p1361_p5 = scmp.lt.s32.totalorder %s1352_s7, %s1352_s7 }
  0x4e   : > { %p1355_p8 = pnand %p1353_p6, %p1644_p13  ;;  %p1362_p7 = por %p1361_p5, %p1360_p3 }
  0x50   : > { %p1356_p0 = pneg %p1355_p8 }
  0x52   : > { %p1363_p10 = pnand %p1362_p7, %p1356_p0 }
  0x54   : > { %1366 = shalt.err (!%p1363_p10)
}
  0x55   : > { %1215 = dma.hbm_to_vmem [thread:$0]  (!%p1628_p11), %s1980_s2, 2048, %s219_s12, [#allocation6], %s1536_s26, %s1536_s26, %s1537_s30  }
  0x56   : > { %s1538_s11 = smov [#allocation10]   ;;  %s1367_s16 = scalar_lea.hbm %s1982_s4, 16 }
  0x57   : > { %s245_s13 = sshll.u32 %s1538_s11, 4  ;;  %p1368_p9 = scmp.ne.s32.totalorder %s1982_s4, %s1367_s16  ;;  %s246_s13 = int_to_ptr.vmem [resolvable:$true] %s245_s13 }
  0x58   : > { %p1374_p1 = scmp.lt.u32.totalorder %s1367_s16, %s1982_s4 }
  0x59   : > { %p1370_p12 = pnand %p1368_p9, %p1644_p13 }
  0x5b   : > { %p1371_p2 = pneg %p1370_p12 }
  0x5d   : > { %p1376_p4 = pnand %p1374_p1, %p1371_p2 }
  0x5f   : > { %1379 = shalt.err (!%p1376_p4)
}
  0x60   : > { %s1380_s12 = scalar_lea.vmem %s246_s13, 16  ;;  %s1387_s10 = scalar_lea.vmem %s246_s13, 32 }
  0x61   : > { %p1381_p6 = scmp.ne.s32.totalorder %s246_s13, %s1380_s12  ;;  %p1388_p3 = scmp.lt.s32.totalorder %s246_s13, %s246_s13 }
  0x62   : > { %p1389_p5 = scmp.lt.s32.totalorder %s1387_s10, %s1380_s12 }
  0x63   : > { %p1383_p8 = pnand %p1381_p6, %p1644_p13 }
  0x64   : > { %p1390_p7 = por %p1389_p5, %p1388_p3 }
  0x65   : > { %p1384_p0 = pneg %p1383_p8 }
  0x67   : > { %p1391_p10 = pnand %p1390_p7, %p1384_p0 }
  0x69   : > { %1394 = shalt.err (!%p1391_p10)
}
  0x6a   : > { %1221 = dma.hbm_to_vmem [thread:$0]  (!%p1628_p11), %s1982_s4, 16, %s246_s13, [#allocation9]  }
  0x6b   : > { %s1727_s18 = sadd.s32 1, %s1531_s24   ;;  %s35_s14 = sadd.s32 1, %s1527_s23 }
  0x6c   : > { %s32_s8 = ssub.s32 %s1531_s24, %s1727_s18  ;;  %p42_p13 = scmp.ne.s32.totalorder %s1527_s23, %s1523_s22 }
  0x6d   : > { %p33_p9 = scmp.eq.s32.totalorder %s32_s8, 0  ;;  %p43_p12 = scmp.eq.s32.totalorder %s1531_s24, 0 }
  0x6e   : > { %p1993_p2 = scmp.eq.s32.totalorder %s1600_s25, 1  ;;  %p1237_p4 = scmp.lt.s32.totalorder %s1531_s24, 2 }
  0x6f   : > { %s1743_s16 = scalar_select %p33_p9, %s1527_s23, %s35_s14  }
  0x70   : > { %p1737_p1 = por %p1993_p2, %p42_p13  ;;  %p44_p6 = por %p43_p12, %p42_p13 }
  0x71   : > { %s256_s17 = sand.u32 1, %s1527_s23   ;;  %s944_s13 = sshll.u32 %s1531_s24, 11 }
  0x72   : > { %s923_s19 = sshll.u32 %s256_s17, 7  ;;  %s1750_s12 = scalar_lea.hbm %s1978_s0, %s944_s13 }
  0x73   : > { %s260_s10 = scalar_lea.vmem [#allocation2], %s923_s19  ;;  %p1754_p11 = pnand %p1237_p4, %p44_p6 }
  0x74   : > { %s267_s9 = sshll.u32 %s260_s10, 4  ;;  %s1758_s14 = scalar_lea.sflag [#allocation3], %s256_s17  ;;  %s1752_s9 = int_to_ptr.vmem [resolvable:$true] %s267_s9 }
  0x75   : > { %s1395_s8 = scalar_lea.hbm %s1750_s12, 2048  ;;  %p1397_p0 = pneg %p1754_p11 }
  0x76   : > { %p1396_p8 = scmp.ne.s32.totalorder %s1750_s12, %s1395_s8  ;;  %s1400_s20 = scalar_lea.hbm %s1978_s0, 4096 }
  0x77   : > { %p1401_p7 = scmp.lt.u32.totalorder %s1750_s12, %s1978_s0  ;;  %p1402_p10 = scmp.lt.u32.totalorder %s1400_s20, %s1395_s8 }
  0x78   : > { %p1398_p3 = pnand %p1397_p0, %p1396_p8  ;;  %p1404_p9 = scmp.lt.u32.totalorder %s1395_s8, %s1750_s12 }
  0x79   : > { %p1403_p13 = por %p1402_p10, %p1401_p7 }
  0x7a   : > { %p1399_p5 = pneg %p1398_p3 }
  0x7b   : > { %p1405_p12 = por %p1404_p9, %p1403_p13 }
  0x7d   : > { %p1406_p2 = pnand %p1405_p12, %p1399_p5 }
  0x7f   : > { %1409 = shalt.err (!%p1406_p2)
}
  0x80   : > { %s1410_s17 = scalar_lea.vmem %s1752_s9, 2048  ;;  %s1539_s19 = smov [#allocation2]  }
  0x81   : > { %p1411_p4 = scmp.ne.s32.totalorder %s1752_s9, %s1410_s17  ;;  %s1415_s13 = sshll.u32 %s1539_s19, 4  ;;  %s1416_s13 = int_to_ptr.vmem [resolvable:$false] %s1415_s13 }
  0x82   : > { %s1417_s7 = scalar_lea.vmem %s1416_s13, 4096  ;;  %p1418_p3 = scmp.lt.s32.totalorder %s1752_s9, %s1416_s13 }
  0x83   : > { %p1413_p6 = pnand %p1411_p4, %p1397_p0  ;;  %p1419_p7 = scmp.lt.s32.totalorder %s1417_s7, %s1410_s17 }
  0x85   : > { %p1414_p8 = pneg %p1413_p6  ;;  %p1420_p10 = por %p1419_p7, %p1418_p3 }
  0x87   : > { %p1421_p13 = pnand %p1420_p10, %p1414_p8 }
  0x89   : > { %1424 = shalt.err (!%p1421_p13)
}
  0x8a   : > { %1225 = dma.hbm_to_vmem [thread:$0]  (!%p1754_p11), %s1750_s12, 2048, %s1752_s9, %s1758_s14, %s1536_s26, %s1536_s26, %s1537_s30  }
  0x8b   : > { %p1996_p0 = scmp.ne.s32.totalorder %s1990_s29, 0 }
  0x8c   : > { %s1792_s8 = sand.u32 (!%p1996_p0), 1, %s1523_s22   ;;  %p1997_p5 = scmp.ne.s32.totalorder (!%p1996_p0), %s1988_s27, 0 }
  0x8d   : > { %279 = sbr.rel (%p1996_p0) target bundleno = 666 (0x29a), region = 40  ;;  %s1795_s20 = sshll.u32 (!%p1996_p0), %s1792_s8, 7 }
  0x8e   : > { %s282_s11 = scalar_lea.sflag (!%p1996_p0), [#allocation3], %s1792_s8  ;;  %s1799_s10 = scalar_lea.vmem (!%p1996_p0), [#allocation2], %s1795_s20 }
  0x94   : > { %1498 = dma.done.wait (%p1997_p5), %s282_s11, 2048  }
  0x95   : > { %1500 = vsyncadd (%p1997_p5), %s282_s11, 4294965248  ;;  %p1998_p11 = scmp.eq.s32.totalorder %s1600_s25, 0 }
  0x97   : > { %1502 = dma.done.wait (%p1998_p11), [#allocation6], 2064   ;;  %p1999_p9 = pmov %p1998_p11 }
  0x99   : > { %1504 = vsyncadd (%p1999_p9), [#allocation6], 4294965232  ;;  %p2000_p12 = pmov %p1999_p9 }
  0x9a   : > { %p2001_p2 = pmov %p1999_p9 }
  0x9b   : > { %1506 = dma.done.wait (%p2000_p12), [#allocation9], 2064  }
  0x9c   : > { %1508 = vsyncadd (%p2001_p2), [#allocation9], 4294965232  ;;  %v354_v0 = vld [vmem:[#allocation7] sm:$0xff]  ;;  %v355_v1 = vld [vmem:[#allocation7 + $0x8] sm:$0xff]  ;;  %s1834_s27 = scalar_lea.vmem [#allocation12], %s1795_s20  ;;  %s945_s29 = sshll.u32 %s1600_s25, 11 }
  0x9d   : > { %v356_v2 = vld [vmem:[#allocation7 + $0x10] sm:$0xff]  ;;  %v1123_v3 = vpack.c.bf16 %v355_v1, %v354_v0  ;;  %v357_v4 = vld [vmem:[#allocation7 + $0x18] sm:$0xff]  ;;  %v358_v6 = vld [vmem:[#allocation7 + $0x20] sm:$0xff]  ;;  %s1872_s12 = scalar_lea.hbm %s1984_s6, %s945_s29  ;;  %s773_s9 = sshll.u32 %s1834_s27, 4  ;;  %s1875_s9 = int_to_ptr.vmem [resolvable:$true] %s773_s9 }
  0x9e   : > { %v1127_v5 = vpack.c.bf16 %v357_v4, %v356_v2  ;;  %v359_v7 = vld [vmem:[#allocation7 + $0x28] sm:$0xff]  ;;  %v338_v9 = vld [vmem:[%s1799_s10] sm:$0xff]  ;;  %v360_v10 = vld [vmem:[#allocation7 + $0x30] sm:$0xff]  ;;  %s744_s14 = scalar_lea.sflag [#allocation13], %s1792_s8  ;;  %s1425_s17 = scalar_lea.vmem %s1875_s9, 2048 }
  0x9f   : > { %1124 = vmatprep.subr.bf16.mxu0 %v1123_v3  ;;  %v1131_v8 = vpack.c.bf16 %v359_v7, %v358_v6  ;;  %v361_v11 = vld [vmem:[#allocation7 + $0x38] sm:$0xff]  ;;  %1043 = vmatprep.mubr.f32.mxu0 %v338_v9  ;;  %v362_v13 = vld [vmem:[#allocation7 + $0x40] sm:$0xff]  ;;  %v363_v14 = vld [vmem:[#allocation7 + $0x48] sm:$0xff]  ;;  %p1426_p4 = scmp.ne.s32.totalorder %s1875_s9, %s1425_s17  ;;  %s1540_s19 = smov [#allocation12]  }
  0xa0   : > { %1126 = vmatpush3.bf16.msra.mxu0 %v1123_v3  ;;  %v1135_v12 = vpack.c.bf16 %v361_v11, %v360_v10  ;;  %v554_v15 = vld [vmem:[#allocation8] sm:$0xff]  ;;  %v555_v16 = vld [vmem:[#allocation8 + $0x8] sm:$0xff]  ;;  %v556_v17 = vld [vmem:[#allocation8 + $0x10] sm:$0xff]  ;;  %v1139_v21 = vpack.c.bf16 %v363_v14, %v362_v13  ;;  %s1429_s13 = sshll.u32 %s1540_s19, 4  ;;  %s1430_s13 = int_to_ptr.vmem [resolvable:$false] %s1429_s13 }
  0xa1   : > { %1128 = vmatprep.subr.bf16.mxu0 %v1127_v5  ;;  %v557_v18 = vld [vmem:[#allocation8 + $0x18] sm:$0xff]  ;;  %v1155_v19 = vpack.c.bf16 %v555_v16, %v554_v15  ;;  %v558_v22 = vld [vmem:[#allocation8 + $0x20] sm:$0xff]  ;;  %v559_v23 = vld [vmem:[#allocation8 + $0x28] sm:$0xff]  ;;  %p1427_p6 = pnand %p1426_p4, %p1737_p1  ;;  %s1431_s7 = scalar_lea.vmem %s1430_s13, 4096 }
  0xa2   : > { %v1159_v20 = vpack.c.bf16 %v557_v18, %v556_v17  ;;  %v364_v24 = vld [vmem:[#allocation7 + $0x50] sm:$0xff]  ;;  %v365_v25 = vld [vmem:[#allocation7 + $0x58] sm:$0xff]  ;;  %v1163_v26 = vpack.c.bf16 %v559_v23, %v558_v22  ;;  %v366_v30 = vld [vmem:[#allocation7 + $0x60] sm:$0xff]  ;;  %p1432_p3 = scmp.lt.s32.totalorder %s1875_s9, %s1430_s13  ;;  %p1433_p7 = scmp.lt.s32.totalorder %s1431_s7, %s1425_s17 }
  0xa3   : > { %1156 = vmatprep.subr.bf16.mxu1 %v1155_v19  ;;  %v1143_v27 = vpack.c.bf16 %v365_v25, %v364_v24  ;;  %v560_v28 = vld [vmem:[#allocation8 + $0x30] sm:$0xff]  ;;  %v561_v29 = vld [vmem:[#allocation8 + $0x38] sm:$0xff]  ;;  %v367_v31 = vld [vmem:[#allocation7 + $0x68] sm:$0xff]  ;;  %p1428_p8 = pneg %p1427_p6 }
  0xa4   : > { %1130 = vmatpush3.bf16.msra.mxu0 %v1127_v5  ;;  %1158 = vmatpush3.bf16.msra.mxu1 %v1155_v19  ;;  %v1167_v32 = vpack.c.bf16 %v561_v29, %v560_v28  ;;  %v1147_v33 = vpack.c.bf16 %v367_v31, %v366_v30  ;;  %v562_v34 = vld [vmem:[#allocation8 + $0x40] sm:$0xff]  ;;  %v563_v35 = vld [vmem:[#allocation8 + $0x48] sm:$0xff]  ;;  %v368_v36 = vld [vmem:[#allocation7 + $0x70] sm:$0xff]  ;;  %p1434_p10 = por %p1433_p7, %p1432_p3 }
  0xa5   : > { %1132 = vmatprep.subr.bf16.mxu0 %v1131_v8  ;;  %1160 = vmatprep.subr.bf16.mxu1 %v1159_v20  ;;  %v369_v37 = vld [vmem:[#allocation7 + $0x78] sm:$0xff]  ;;  %v1171_v38 = vpack.c.bf16 %v563_v35, %v562_v34  ;;  %v564_v40 = vld [vmem:[#allocation8 + $0x50] sm:$0xff]  ;;  %v566_v43 = vld [vmem:[#allocation8 + $0x60] sm:$0xff] }
  0xa6   : > { %v1151_v39 = vpack.c.bf16 %v369_v37, %v368_v36  ;;  %v565_v41 = vld [vmem:[#allocation8 + $0x58] sm:$0xff]  ;;  %v567_v44 = vld [vmem:[#allocation8 + $0x68] sm:$0xff]  ;;  %v568_v61 = vld [vmem:[#allocation8 + $0x70] sm:$0xff]  ;;  %p1435_p13 = pnand %p1434_p10, %p1428_p8 }
  0xa7   : > { %v1175_v42 = vpack.c.bf16 %v565_v41, %v564_v40  ;;  %v339_v45 = vld [vmem:[%s1799_s10 + $0x8] sm:$0xff]  ;;  %v1179_v46 = vpack.c.bf16 %v567_v44, %v566_v43  ;;  %v340_v47 = vld [vmem:[%s1799_s10 + $0x10] sm:$0xff]  ;;  %v341_v48 = vld [vmem:[%s1799_s10 + $0x18] sm:$0xff] }
  0xa8   : > { %1134 = vmatpush3.bf16.msra.mxu0 %v1131_v8  ;;  %1162 = vmatpush3.bf16.msra.mxu1 %v1159_v20  ;;  %v342_v49 = vld [vmem:[%s1799_s10 + $0x20] sm:$0xff]  ;;  %v343_v50 = vld [vmem:[%s1799_s10 + $0x28] sm:$0xff]  ;;  %v344_v51 = vld [vmem:[%s1799_s10 + $0x30] sm:$0xff] }
  0xa9   : > { %1136 = vmatprep.subr.bf16.mxu0 %v1135_v12  ;;  %1164 = vmatprep.subr.bf16.mxu1 %v1163_v26  ;;  %v345_v52 = vld [vmem:[%s1799_s10 + $0x38] sm:$0xff]  ;;  %v346_v53 = vld [vmem:[%s1799_s10 + $0x40] sm:$0xff]  ;;  %v347_v54 = vld [vmem:[%s1799_s10 + $0x48] sm:$0xff] }
  0xaa   : > { %v348_v55 = vld [vmem:[%s1799_s10 + $0x50] sm:$0xff]  ;;  %v349_v56 = vld [vmem:[%s1799_s10 + $0x58] sm:$0xff]  ;;  %v350_v57 = vld [vmem:[%s1799_s10 + $0x60] sm:$0xff] }
  0xab   : > { %v351_v58 = vld [vmem:[%s1799_s10 + $0x68] sm:$0xff]  ;;  %v352_v59 = vld [vmem:[%s1799_s10 + $0x70] sm:$0xff]  ;;  %v353_v60 = vld [vmem:[%s1799_s10 + $0x78] sm:$0xff] }
  0xac   : > { %1138 = vmatpush3.bf16.msra.mxu0 %v1135_v12  ;;  %1166 = vmatpush3.bf16.msra.mxu1 %v1163_v26  ;;  %v569_v62 = vld [vmem:[#allocation8 + $0x78] sm:$0xff] }
  0xad   : > { %1140 = vmatprep.subr.bf16.mxu0 %v1139_v21  ;;  %1168 = vmatprep.subr.bf16.mxu1 %v1167_v32  ;;  %v1183_v63 = vpack.c.bf16 %v569_v62, %v568_v61  ;;  %v1829_v0 = vld [vmem:[#allocation5] ss:$0 sm:$0xff] }
  0xb0   : > { %1142 = vmatpush3.bf16.msra.mxu0 %v1139_v21  ;;  %1170 = vmatpush3.bf16.msra.mxu1 %v1167_v32 }
  0xb1   : > { %1144 = vmatprep.subr.bf16.mxu0 %v1143_v27  ;;  %1172 = vmatprep.subr.bf16.mxu1 %v1171_v38 }
  0xb4   : > { %1146 = vmatpush3.bf16.msra.mxu0 %v1143_v27  ;;  %1174 = vmatpush3.bf16.msra.mxu1 %v1171_v38 }
  0xb5   : > { %1148 = vmatprep.subr.bf16.mxu0 %v1147_v33  ;;  %1176 = vmatprep.subr.bf16.mxu1 %v1175_v42 }
  0xb8   : > { %1150 = vmatpush3.bf16.msra.mxu0 %v1147_v33  ;;  %1178 = vmatpush3.bf16.msra.mxu1 %v1175_v42 }
  0xb9   : > { %1152 = vmatprep.subr.bf16.mxu0 %v1151_v39  ;;  %1180 = vmatprep.subr.bf16.mxu1 %v1179_v46 }
  0xbc   : > { %1154 = vmatpush3.bf16.msra.mxu0 %v1151_v39  ;;  %1182 = vmatpush3.bf16.msra.mxu1 %v1179_v46 }
  0xbd   : > { %1184 = vmatprep.subr.bf16.mxu1 %v1183_v63 }
  0xbf   : > { %1044 = vmatmul.mubr.f32.vlgmr.msra.gmra.mrb[0].mxu0 %v339_v45 }
  0xc0   : > { %1046 = vmatprep.mubr.f32.mxu0 %v340_v47  ;;  %1186 = vmatpush3.bf16.msra.mxu1 %v1183_v63 }
  0xc3   : > { %1047 = vmatmul.mubr.f32.gmra.mrb[2].mxu0 %v341_v48 }
  0xc4   : > { %1049 = vmatprep.mubr.f32.mxu0 %v342_v49 }
  0xc7   : > { %1050 = vmatmul.mubr.f32.gmra.mrb[4].mxu0 %v343_v50 }
  0xc8   : > { %1052 = vmatprep.mubr.f32.mxu0 %v344_v51 }
  0xcb   : > { %1053 = vmatmul.mubr.f32.gmra.mrb[6].mxu0 %v345_v52 }
  0xcc   : > { %1055 = vmatprep.mubr.f32.mxu0 %v346_v53 }
  0xcf   : > { %1056 = vmatmul.mubr.f32.gmra.mrb[8].mxu0 %v347_v54 }
  0xd0   : > { %1058 = vmatprep.mubr.f32.mxu0 %v348_v55 }
  0xd3   : > { %1059 = vmatmul.mubr.f32.gmra.mrb[10].mxu0 %v349_v56 }
  0xd4   : > { %1061 = vmatprep.mubr.f32.mxu0 %v350_v57 }
  0xd7   : > { %1062 = vmatmul.mubr.f32.gmra.mrb[12].mxu0 %v351_v58 }
  0xd8   : > { %1064 = vmatprep.mubr.f32.mxu0 %v352_v59 }
  0xdb   : > { %1065 = vmatmul.mubr.f32.gmra.mrb[14].mxu0 %v353_v60 }
 0x192   : > { %v1045_v1 = vpop.f32.mrb[0].mxu0 }
 0x193   : > { %v449_v2 = vadd.f32 %v1045_v1, %v1829_v0  ;;  %v443_v3 = vpop.f32.mrb[1].mxu0 }
 0x194   : > { %v444_v4 = vadd.f32 %v1829_v0, %v443_v3 }
 0x195   : > { %v523_v5 = vmax.f32 %v449_v2, 0.0 }
 0x196   : > { %v522_v6 = vmax.f32 %v444_v4, 0.0  ;;  %v1048_v7 = vpop.f32.mrb[2].mxu0 }
 0x197   : > { %539 = vst [vmem:[%s1834_s27 + $0x8] sm:$0xff] %v523_v5  ;;  %v459_v8 = vadd.f32 %v1048_v7, %v1829_v0  ;;  %v453_v9 = vpop.f32.mrb[3].mxu0 }
 0x198   : > { %538 = vst [vmem:[%s1834_s27] sm:$0xff] %v522_v6  ;;  %v454_v10 = vadd.f32 %v1829_v0, %v453_v9  ;;  %1099 = vmatprep.mubr.f32.mxu1 %v522_v6 }
 0x199   : > { %v525_v11 = vmax.f32 %v459_v8, 0.0  ;;  %1100 = vmatmul.mubr.f32.vlgmr.msra.gmra.mrb[0].mxu1 %v523_v5 }
 0x19a   : > { %v524_v12 = vmax.f32 %v454_v10, 0.0  ;;  %v1051_v13 = vpop.f32.mrb[4].mxu0 }
 0x19b   : > { %541 = vst [vmem:[%s1834_s27 + $0x18] sm:$0xff] %v525_v11  ;;  %v469_v14 = vadd.f32 %v1051_v13, %v1829_v0  ;;  %v463_v15 = vpop.f32.mrb[5].mxu0 }
 0x19c   : > { %540 = vst [vmem:[%s1834_s27 + $0x10] sm:$0xff] %v524_v12  ;;  %v464_v16 = vadd.f32 %v1829_v0, %v463_v15  ;;  %1102 = vmatprep.mubr.f32.mxu1 %v524_v12 }
 0x19d   : > { %v527_v17 = vmax.f32 %v469_v14, 0.0  ;;  %1103 = vmatmul.mubr.f32.gmra.mrb[2].mxu1 %v525_v11 }
 0x19e   : > { %v526_v18 = vmax.f32 %v464_v16, 0.0  ;;  %v1054_v19 = vpop.f32.mrb[6].mxu0 }
 0x19f   : > { %543 = vst [vmem:[%s1834_s27 + $0x28] sm:$0xff] %v527_v17  ;;  %v479_v20 = vadd.f32 %v1054_v19, %v1829_v0  ;;  %v473_v21 = vpop.f32.mrb[7].mxu0 }
 0x1a0   : > { %542 = vst [vmem:[%s1834_s27 + $0x20] sm:$0xff] %v526_v18  ;;  %v474_v22 = vadd.f32 %v1829_v0, %v473_v21  ;;  %1105 = vmatprep.mubr.f32.mxu1 %v526_v18 }
 0x1a1   : > { %v529_v23 = vmax.f32 %v479_v20, 0.0  ;;  %1106 = vmatmul.mubr.f32.gmra.mrb[4].mxu1 %v527_v17 }
 0x1a2   : > { %v528_v24 = vmax.f32 %v474_v22, 0.0  ;;  %v1057_v25 = vpop.f32.mrb[8].mxu0 }
 0x1a3   : > { %545 = vst [vmem:[%s1834_s27 + $0x38] sm:$0xff] %v529_v23  ;;  %v489_v26 = vadd.f32 %v1057_v25, %v1829_v0  ;;  %v483_v27 = vpop.f32.mrb[9].mxu0 }
 0x1a4   : > { %544 = vst [vmem:[%s1834_s27 + $0x30] sm:$0xff] %v528_v24  ;;  %v484_v28 = vadd.f32 %v1829_v0, %v483_v27  ;;  %1108 = vmatprep.mubr.f32.mxu1 %v528_v24 }
 0x1a5   : > { %v531_v29 = vmax.f32 %v489_v26, 0.0  ;;  %1109 = vmatmul.mubr.f32.gmra.mrb[6].mxu1 %v529_v23 }
 0x1a6   : > { %v530_v30 = vmax.f32 %v484_v28, 0.0  ;;  %v1060_v31 = vpop.f32.mrb[10].mxu0 }
 0x1a7   : > { %547 = vst [vmem:[%s1834_s27 + $0x48] sm:$0xff] %v531_v29  ;;  %v499_v32 = vadd.f32 %v1060_v31, %v1829_v0  ;;  %v493_v33 = vpop.f32.mrb[11].mxu0 }
 0x1a8   : > { %546 = vst [vmem:[%s1834_s27 + $0x40] sm:$0xff] %v530_v30  ;;  %v494_v34 = vadd.f32 %v1829_v0, %v493_v33  ;;  %1111 = vmatprep.mubr.f32.mxu1 %v530_v30 }
 0x1a9   : > { %v533_v35 = vmax.f32 %v499_v32, 0.0  ;;  %1112 = vmatmul.mubr.f32.gmra.mrb[8].mxu1 %v531_v29 }
 0x1aa   : > { %v532_v36 = vmax.f32 %v494_v34, 0.0  ;;  %v1063_v37 = vpop.f32.mrb[12].mxu0 }
 0x1ab   : > { %549 = vst [vmem:[%s1834_s27 + $0x58] sm:$0xff] %v533_v35  ;;  %v509_v38 = vadd.f32 %v1063_v37, %v1829_v0  ;;  %v503_v39 = vpop.f32.mrb[13].mxu0 }
 0x1ac   : > { %548 = vst [vmem:[%s1834_s27 + $0x50] sm:$0xff] %v532_v36  ;;  %v504_v40 = vadd.f32 %v1829_v0, %v503_v39  ;;  %1114 = vmatprep.mubr.f32.mxu1 %v532_v36 }
 0x1ad   : > { %v535_v41 = vmax.f32 %v509_v38, 0.0  ;;  %1115 = vmatmul.mubr.f32.gmra.mrb[10].mxu1 %v533_v35 }
 0x1ae   : > { %v534_v42 = vmax.f32 %v504_v40, 0.0  ;;  %v1066_v43 = vpop.f32.mrb[14].mxu0 }
 0x1af   : > { %551 = vst [vmem:[%s1834_s27 + $0x68] sm:$0xff] %v535_v41  ;;  %v519_v44 = vadd.f32 %v1066_v43, %v1829_v0  ;;  %v513_v45 = vpop.f32.mrb[15].mxu0 }
 0x1b0   : > { %550 = vst [vmem:[%s1834_s27 + $0x60] sm:$0xff] %v534_v42  ;;  %v514_v46 = vadd.f32 %v1829_v0, %v513_v45  ;;  %1117 = vmatprep.mubr.f32.mxu1 %v534_v42 }
 0x1b1   : > { %v537_v47 = vmax.f32 %v519_v44, 0.0  ;;  %1118 = vmatmul.mubr.f32.gmra.mrb[12].mxu1 %v535_v41 }
 0x1b2   : > { %v536_v48 = vmax.f32 %v514_v46, 0.0 }
 0x1b3   : > { %553 = vst [vmem:[%s1834_s27 + $0x78] sm:$0xff] %v537_v47 }
 0x1b4   : > { %552 = vst [vmem:[%s1834_s27 + $0x70] sm:$0xff] %v536_v48  ;;  %1120 = vmatprep.mubr.f32.mxu1 %v536_v48 }
 0x1b5   : > { %1121 = vmatmul.mubr.f32.gmra.mrb[14].mxu1 %v537_v47 }
 0x1b6   : > { %1438 = shalt.err (!%p1435_p13)
}
 0x1b7   : > { %s1439_s11 = scalar_lea.hbm %s1872_s12, 2048  ;;  %s1443_s26 = scalar_lea.hbm %s1984_s6, 4096 }
 0x1b8   : > { %p1440_p0 = scmp.ne.s32.totalorder %s1872_s12, %s1439_s11  ;;  %p1444_p9 = scmp.lt.u32.totalorder %s1872_s12, %s1984_s6 }
 0x1b9   : > { %p1445_p12 = scmp.lt.u32.totalorder %s1443_s26, %s1439_s11  ;;  %p1447_p4 = scmp.lt.u32.totalorder %s1439_s11, %s1872_s12 }
 0x1ba   : > { %p1441_p5 = pnand %p1440_p0, %p1737_p1 }
 0x1bb   : > { %p1446_p2 = por %p1445_p12, %p1444_p9 }
 0x1bc   : > { %p1442_p11 = pneg %p1441_p5 }
 0x1bd   : > { %p1448_p6 = por %p1447_p4, %p1446_p2 }
 0x1bf   : > { %p1449_p8 = pnand %p1448_p6, %p1442_p11 }
 0x1c1   : > { %1452 = shalt.err (!%p1449_p8)
}
 0x1c2   : > { %s1541_s17 = smov 128   ;;  %s1542_s13 = smov 8   ;;  %v935_v49 = vld [vmem:[#allocation10] ss:$0 sm:$0xff] }
 0x1c3   : > { %1206 = dma.vmem_to_hbm [thread:$0]  (%p1737_p1), %s1875_s9, 2048, %s1872_s12, %s744_s14, %s1541_s17, %s1541_s17, %s1542_s13  }
 0x1c4   : > { %s1905_s7 = scalar_lea.vmem [#allocation11], %s1795_s20  ;;  %s1927_s14 = scalar_lea.hbm %s1983_s5, %s945_s29 }
 0x1c5   : > { %s757_s20 = sshll.u32 %s1905_s7, 4  ;;  %s739_s11 = scalar_lea.sflag [#allocation4], %s1792_s8  ;;  %s1929_s20 = int_to_ptr.vmem [resolvable:$true] %s757_s20 }
 0x1c6   : > { %s1453_s10 = scalar_lea.vmem %s1929_s20, 2048  ;;  %s1543_s27 = smov [#allocation11]  }
 0x1c7   : > { %p1454_p3 = scmp.ne.s32.totalorder %s1929_s20, %s1453_s10  ;;  %s1457_s25 = sshll.u32 %s1543_s27, 4  ;;  %s1458_s25 = int_to_ptr.vmem [resolvable:$false] %s1457_s25 }
 0x1c8   : > { %s1459_s26 = scalar_lea.vmem %s1458_s25, 4096  ;;  %p1460_p13 = scmp.lt.s32.totalorder %s1929_s20, %s1458_s25 }
 0x1c9   : > { %p1455_p7 = pnand %p1454_p3, %p1737_p1  ;;  %p1461_p0 = scmp.lt.s32.totalorder %s1459_s26, %s1453_s10 }
 0x1cb   : > { %p1456_p10 = pneg %p1455_p7  ;;  %p1462_p5 = por %p1461_p0, %p1460_p13 }
 0x1cd   : > { %p1463_p11 = pnand %p1462_p5, %p1456_p10 }
 0x26c   : > { %v1101_v50 = vpop.f32.mrb[0].mxu1 }
 0x26d   : > { %v649_v51 = vadd.f32 %v1101_v50, %v935_v49  ;;  %v643_v52 = vpop.f32.mrb[1].mxu1 }
 0x26e   : > { %v644_v53 = vadd.f32 %v935_v49, %v643_v52 }
 0x26f   : > { %723 = vst [vmem:[%s1905_s7 + $0x8] sm:$0xff] %v649_v51 }
 0x270   : > { %722 = vst [vmem:[%s1905_s7] sm:$0xff] %v644_v53  ;;  %v1104_v54 = vpop.f32.mrb[2].mxu1 }
 0x271   : > { %v659_v55 = vadd.f32 %v1104_v54, %v935_v49  ;;  %v653_v56 = vpop.f32.mrb[3].mxu1 }
 0x272   : > { %v654_v57 = vadd.f32 %v935_v49, %v653_v56 }
 0x273   : > { %725 = vst [vmem:[%s1905_s7 + $0x18] sm:$0xff] %v659_v55 }
 0x274   : > { %724 = vst [vmem:[%s1905_s7 + $0x10] sm:$0xff] %v654_v57  ;;  %v1107_v58 = vpop.f32.mrb[4].mxu1 }
 0x275   : > { %v669_v59 = vadd.f32 %v1107_v58, %v935_v49  ;;  %v663_v60 = vpop.f32.mrb[5].mxu1 }
 0x276   : > { %v664_v61 = vadd.f32 %v935_v49, %v663_v60 }
 0x277   : > { %727 = vst [vmem:[%s1905_s7 + $0x28] sm:$0xff] %v669_v59 }
 0x278   : > { %726 = vst [vmem:[%s1905_s7 + $0x20] sm:$0xff] %v664_v61  ;;  %v1110_v62 = vpop.f32.mrb[6].mxu1 }
 0x279   : > { %v679_v63 = vadd.f32 %v1110_v62, %v935_v49  ;;  %v673_v0 = vpop.f32.mrb[7].mxu1 }
 0x27a   : > { %v674_v1 = vadd.f32 %v935_v49, %v673_v0 }
 0x27b   : > { %729 = vst [vmem:[%s1905_s7 + $0x38] sm:$0xff] %v679_v63 }
 0x27c   : > { %728 = vst [vmem:[%s1905_s7 + $0x30] sm:$0xff] %v674_v1  ;;  %v1113_v2 = vpop.f32.mrb[8].mxu1 }
 0x27d   : > { %v689_v3 = vadd.f32 %v1113_v2, %v935_v49  ;;  %v683_v4 = vpop.f32.mrb[9].mxu1 }
 0x27e   : > { %v684_v5 = vadd.f32 %v935_v49, %v683_v4 }
 0x27f   : > { %731 = vst [vmem:[%s1905_s7 + $0x48] sm:$0xff] %v689_v3 }
 0x280   : > { %730 = vst [vmem:[%s1905_s7 + $0x40] sm:$0xff] %v684_v5  ;;  %v1116_v6 = vpop.f32.mrb[10].mxu1 }
 0x281   : > { %v699_v7 = vadd.f32 %v1116_v6, %v935_v49  ;;  %v693_v8 = vpop.f32.mrb[11].mxu1 }
 0x282   : > { %v694_v9 = vadd.f32 %v935_v49, %v693_v8 }
 0x283   : > { %733 = vst [vmem:[%s1905_s7 + $0x58] sm:$0xff] %v699_v7 }
 0x284   : > { %732 = vst [vmem:[%s1905_s7 + $0x50] sm:$0xff] %v694_v9  ;;  %v1119_v10 = vpop.f32.mrb[12].mxu1 }
 0x285   : > { %v709_v11 = vadd.f32 %v1119_v10, %v935_v49  ;;  %v703_v12 = vpop.f32.mrb[13].mxu1 }
 0x286   : > { %v704_v13 = vadd.f32 %v935_v49, %v703_v12 }
 0x287   : > { %735 = vst [vmem:[%s1905_s7 + $0x68] sm:$0xff] %v709_v11 }
 0x288   : > { %734 = vst [vmem:[%s1905_s7 + $0x60] sm:$0xff] %v704_v13  ;;  %v1122_v14 = vpop.f32.mrb[14].mxu1 }
 0x289   : > { %v719_v15 = vadd.f32 %v1122_v14, %v935_v49  ;;  %v713_v16 = vpop.f32.mrb[15].mxu1 }
 0x28a   : > { %v714_v17 = vadd.f32 %v935_v49, %v713_v16 }
 0x28b   : > { %737 = vst [vmem:[%s1905_s7 + $0x78] sm:$0xff] %v719_v15 }
 0x28c   : > { %736 = vst [vmem:[%s1905_s7 + $0x70] sm:$0xff] %v714_v17 }
 0x28d   : > { %1466 = shalt.err (!%p1463_p11)
}
 0x28e   : > { %s1467_s29 = scalar_lea.hbm %s1927_s14, 2048  ;;  %s1471_s7 = scalar_lea.hbm %s1983_s5, 4096 }
 0x28f   : > { %p1468_p9 = scmp.ne.s32.totalorder %s1927_s14, %s1467_s29  ;;  %p1472_p4 = scmp.lt.u32.totalorder %s1927_s14, %s1983_s5 }
 0x290   : > { %p1473_p6 = scmp.lt.u32.totalorder %s1471_s7, %s1467_s29  ;;  %p1475_p3 = scmp.lt.u32.totalorder %s1467_s29, %s1927_s14 }
 0x291   : > { %p1469_p12 = pnand %p1468_p9, %p1737_p1 }
 0x292   : > { %p1474_p8 = por %p1473_p6, %p1472_p4 }
 0x293   : > { %p1470_p2 = pneg %p1469_p12 }
 0x294   : > { %p1476_p7 = por %p1475_p3, %p1474_p8 }
 0x296   : > { %p1477_p10 = pnand %p1476_p7, %p1470_p2 }
 0x298   : > { %1480 = shalt.err (!%p1477_p10)
}
 0x299   : > { %1205 = dma.vmem_to_hbm [thread:$0]  (%p1737_p1), %s1929_s20, 2048, %s1927_s14, %s739_s11, %s1541_s17, %s1541_s17, %s1542_s13  }
 0x29a PF: > { %s788_s10 = sand.u32 1, %s1519_s21   ;;  %p2002_p13 = scmp.ne.s32.totalorder %s1989_s28, 0 }
 0x29b   : > { %p2003_p0 = scmp.ge.s32.totalorder %s1531_s24, 2  ;;  %s789_s27 = scalar_lea.sflag [#allocation4], %s788_s10 }
 0x29d   : > { %p1227_p5 = pnand %p2003_p0, %p2002_p13 }
 0x29f   : > { %1510 = dma.done.wait (!%p1227_p5), %s789_s27, 2048  }
 0x2a0   : > { %1512 = vsyncadd (!%p1227_p5), %s789_s27, 4294965248  ;;  %s798_s15 = scalar_lea.sflag [#allocation13], %s788_s10 }
 0x2a1   : > { %1514 = dma.done.wait (!%p1227_p5), %s798_s15, 2048  }
 0x2a2   : > { %1516 = vsyncadd (!%p1227_p5), %s798_s15, 4294965248  ;;  %p25_p1 = scmp.ge.s32.totalorder %s1727_s18, 4   ;;  %s2004_s21 = smov %s1523_s22 }
 0x2a3   : > { %s2005_s22 = smov %s1527_s23  ;;  %s2006_s23 = smov %s1743_s16 }
 0x2a4   : > { %s2007_s24 = smov %s1727_s18  ;;  %27 = sbr.rel (!%p25_p1) target bundleno = 9 (0x9), region = 118 }
 0x2ab   :  { %803 = vsyncpa [#allocation3], 1 }
 0x2ac   :  { %805 = vsyncpa [#allocation3 + $0x1], 1 }
 0x2ad   :  { %806 = vsyncpa [#allocation6], 1 }
 0x2ae   :  { %807 = vsyncpa [#allocation9], 1 }
 0x2af   :  { %808 = vsyncpa [#allocation4], 1 }
 0x2b0   :  { %810 = vsyncpa [#allocation4 + $0x1], 1 }
 0x2b1   :  { %811 = vsyncpa [#allocation13], 1 }
 0x2b2   :  { %813 = vsyncpa [#allocation13 + $0x1], 1 }

</bundles_post_ra>
